<compile_context>
chip_gen: v7x
topology: tpu7x:2x2x1
jax: 0.10.0
libtpu: 0.0.40
codegen_flags: <defaults>
</compile_context>

<pallas_src>
import functools

import jax
import jax.numpy as jnp
from jax.experimental import pallas as pl
from jax.experimental.pallas import tpu as pltpu


def _round_up(x: int, m: int) -> int:
    return ((x + m - 1) // m) * m


def _cdiv(a: int, b: int) -> int:
    return -(-a // b)


def _pad2d(x, rows, cols):
    r, c = x.shape
    if rows == r and cols == c:
        return x
    return jnp.pad(x, ((0, rows - r), (0, cols - c)))


def _choose_tb(B: int, max_tb: int = 1024) -> int:
    """Batch tile: multiple of 16 (bf16 sublane packing), minimal batch padding,
    and an even number (>=2) of grid steps when B is big enough so the
    'parallel' axis splits across v7x's two TensorCores.  On single-TC v5e/v6e
    larger tiles simply amortize per-step pipeline overhead."""
    b16 = _round_up(B, 16)
    if b16 <= 32:                       # tiny batch: one step, overhead-bound anyway
        return b16
    n_tiles = 2                         # even tile count -> balanced 2-TC split
    while _cdiv(b16, n_tiles) > max_tb:
        n_tiles += 2
    return _round_up(_cdiv(b16, n_tiles), 16)


# ----------------------------------------------------------------------------
# One-time parameter preparation (pad to 128 lanes, cast weights to bf16).
# ----------------------------------------------------------------------------
def prepare_params(w1, b1, w2, b2, w3, b3):
    """Call once at parameter-load time.  Weights are (in_features, out_features).

    Returns (padded_param_tuple, dims) where dims = (obs_dim, repr_h, act_h,
    action_dim) must be passed (statically) to actor_policy_forward."""
    obs_dim, repr_h = w1.shape
    act_h = w2.shape[1]
    action_dim = w3.shape[1]

    obs_p = _round_up(obs_dim, 128)
    repr_p = _round_up(repr_h, 128)
    act_p = _round_up(act_h, 128)
    adim_p = _round_up(action_dim, 128)

    w1p = _pad2d(w1.astype(jnp.bfloat16), obs_p, repr_p)
    b1p = jnp.pad(b1.astype(jnp.float32), (0, repr_p - repr_h)).reshape(1, repr_p)
    w2p = _pad2d(w2.astype(jnp.bfloat16), repr_p, act_p)
    b2p = jnp.pad(b2.astype(jnp.float32), (0, act_p - act_h)).reshape(1, act_p)
    w3p = _pad2d(w3.astype(jnp.bfloat16), act_p, adim_p)
    b3p = jnp.pad(b3.astype(jnp.float32), (0, adim_p - action_dim)).reshape(1, adim_p)

    dims = (obs_dim, repr_h, act_h, action_dim)
    return (w1p, b1p, w2p, b2p, w3p, b3p), dims


# ----------------------------------------------------------------------------
# Fused kernel: Linear+ReLU (representation) -> Linear+ReLU -> Linear (logits).
# ----------------------------------------------------------------------------
def _actor_policy_kernel(obs_ref, w1_ref, b1_ref, w2_ref, b2_ref, w3_ref, b3_ref,
                         state_ref, logits_ref):
    # ---- Layer 1: representation (Linear + ReLU) -> 'state' ----
    x = obs_ref[...]                                   # already bf16 (cast in wrapper)
    h1 = jnp.dot(x, w1_ref[...], preferred_element_type=jnp.float32)
    h1 = jnp.maximum(h1 + b1_ref[...], 0.0)            # f32 bias + ReLU (VPU)
    state_ref[...] = h1.astype(state_ref.dtype)         # single store of 'state'

    # ---- Layer 2: actor hidden (Linear + ReLU), stays on-chip ----
    h2 = jnp.dot(h1.astype(jnp.bfloat16), w2_ref[...],
                 preferred_element_type=jnp.float32)
    h2 = jnp.maximum(h2 + b2_ref[...], 0.0)

    # ---- Layer 3: logits (no activation) ----
    logits = jnp.dot(h2.astype(jnp.bfloat16), w3_ref[...],
                     preferred_element_type=jnp.float32)
    logits_ref[...] = (logits + b3_ref[...]).astype(logits_ref.dtype)


@functools.partial(jax.jit, static_argnames=("dims", "max_tb"))
def actor_policy_forward(observation, w1, b1, w2, b2, w3, b3, *, dims, max_tb=1024):
    """Fused forward. Inputs are the PREPARED (padded bf16) params from
    prepare_params. Returns (state, logits); Categorical(logits=logits) is a_dist."""
    B, obs_dim_in = observation.shape
    obs_dim, repr_h, act_h, action_dim = dims
    assert obs_dim_in == obs_dim

    obs_p, repr_p = w1.shape
    act_p, adim_p = w3.shape

    tb = _choose_tb(B, max_tb)
    b_p = _round_up(B, tb)

    # Cast first (bf16), then pad only if needed (pad then writes half the bytes).
    obs = observation.astype(jnp.bfloat16)
    if b_p != B or obs_p != obs_dim:
        obs = jnp.pad(obs, ((0, b_p - B), (0, obs_p - obs_dim)))

    const = lambda i: (0, 0)               # weights: fetched once, VMEM-resident
    batched = lambda i: (i, 0)             # activations: batch-tiled only

    flops = 2 * b_p * (obs_p * repr_p + repr_p * act_p + act_p * adim_p)
    bytes_accessed = (
        b_p * obs_p * 2                                            # obs (bf16)
        + (obs_p * repr_p + repr_p * act_p + act_p * adim_p) * 2   # weights (bf16)
        + (repr_p + act_p + adim_p) * 4                            # biases (f32)
        + b_p * (repr_p + adim_p) * 4                              # outputs (f32)
    )

    state_pad, logits_pad = pl.pallas_call(
        _actor_policy_kernel,
        out_shape=(jax.ShapeDtypeStruct((b_p, repr_p), jnp.float32),
                   jax.ShapeDtypeStruct((b_p, adim_p), jnp.float32)),
        grid_spec=pltpu.PrefetchScalarGridSpec(
            num_scalar_prefetch=0,
            grid=(b_p // tb,),
            in_specs=[
                pl.BlockSpec((tb, obs_p), batched),      # observation (bf16)
                pl.BlockSpec((obs_p, repr_p), const),    # W1 (bf16)
                pl.BlockSpec((1, repr_p), const),        # b1 (f32)
                pl.BlockSpec((repr_p, act_p), const),    # W2 (bf16)
                pl.BlockSpec((1, act_p), const),         # b2 (f32)
                pl.BlockSpec((act_p, adim_p), const),    # W3 (bf16)
                pl.BlockSpec((1, adim_p), const),        # b3 (f32)
            ],
            out_specs=[
                pl.BlockSpec((tb, repr_p), batched),     # state (f32, lane-padded)
                pl.BlockSpec((tb, adim_p), batched),     # logits (f32, lane-padded)
            ],
        ),
        compiler_params=pltpu.CompilerParams(
            dimension_semantics=("parallel",),           # megacore split on v7x
            vmem_limit_bytes=48 * 1024 * 1024,           # safe on 64 MiB v7x VMEM
        ),
        cost_estimate=pl.CostEstimate(flops=flops, transcendentals=0,
                                      bytes_accessed=bytes_accessed),
    )(obs, w1, b1, w2, b2, w3, b3)

    # Slice off batch / lane padding only when it exists.
    state = state_pad if (b_p == B and repr_p == repr_h) else state_pad[:B, :repr_h]
    logits = (logits_pad if (b_p == B and adim_p == action_dim)
              else logits_pad[:B, :action_dim])
    return state, logits


def reference_forward(observation, w1, b1, w2, b2, w3, b3):
    """Pure-JAX reference mirroring the kernel's bf16-MXU / f32-accumulate math."""
    f = lambda a: a.astype(jnp.bfloat16)
    h1 = jnp.maximum(jnp.dot(f(observation), f(w1),
                             preferred_element_type=jnp.float32) + b1, 0.0)
    h2 = jnp.maximum(jnp.dot(f(h1), f(w2),
                             preferred_element_type=jnp.float32) + b2, 0.0)
    logits = jnp.dot(f(h2), f(w3), preferred_element_type=jnp.float32) + b3
    return h1, logits


if __name__ == "__main__":
    key = jax.random.PRNGKey(0)
    B, obs_dim, repr_h, act_h, action_dim = 64, 16, 64, 64, 6
    ks = jax.random.split(key, 7)
    scale = 0.1
    observation = jax.random.normal(ks[0], (B, obs_dim), jnp.float32)
    # Weights stored as (in_features, out_features) == PyTorch nn.Linear weight.T
    w1 = scale * jax.random.normal(ks[1], (obs_dim, repr_h), jnp.float32)
    b1 = scale * jax.random.normal(ks[2], (repr_h,), jnp.float32)
    w2 = scale * jax.random.normal(ks[3], (repr_h, act_h), jnp.float32)
    b2 = scale * jax.random.normal(ks[4], (act_h,), jnp.float32)
    w3 = scale * jax.random.normal(ks[5], (act_h, action_dim), jnp.float32)
    b3 = scale * jax.random.normal(ks[6], (action_dim,), jnp.float32)

    # One-time parameter prep (pad + bf16 cast) -- done at load time, not per call.
    params, dims = prepare_params(w1, b1, w2, b2, w3, b3)
    params = jax.block_until_ready(params)

    state, logits = actor_policy_forward(observation, *params, dims=dims)
    jax.block_until_ready((state, logits))

    ref_state, ref_logits = reference_forward(observation, w1, b1, w2, b2, w3, b3)
    assert state.shape == (B, repr_h) and logits.shape == (B, action_dim)
    assert jnp.allclose(state, ref_state, atol=1e-2, rtol=1e-2)
    assert jnp.allclose(logits, ref_logits, atol=1e-2, rtol=1e-2)

    # ActorPolicy.forward(...) == ({'state': state}, Categorical(logits=logits), None)
    # TODO(synk): the Categorical distribution object (sampling / log_prob) is
    # framework-level and is built in the host wrapper from the raw logits.
    outputs = {"state": state}
    _a_dist_logits = logits
    print("KERNEL_OK")
</pallas_src>

<mosaic_0001>
module attributes {stable_mosaic.version = 11 : i64} {
  func.func @_actor_policy_kernel(%arg0: i32, %arg1: memref<32x128xbf16, #tpu.memory_space<vmem>>, %arg2: memref<128x128xbf16, #tpu.memory_space<vmem>>, %arg3: memref<1x128xf32, #tpu.memory_space<vmem>>, %arg4: memref<128x128xbf16, #tpu.memory_space<vmem>>, %arg5: memref<1x128xf32, #tpu.memory_space<vmem>>, %arg6: memref<128x128xbf16, #tpu.memory_space<vmem>>, %arg7: memref<1x128xf32, #tpu.memory_space<vmem>>, %arg8: memref<32x128xf32, #tpu.memory_space<vmem>>, %arg9: memref<32x128xf32, #tpu.memory_space<vmem>>) attributes {dimension_semantics = [#tpu.dimension_semantics<parallel>], iteration_bounds = array<i64: 2>, scalar_prefetch = 0 : i64, scratch_operands = 0 : i64, tpu.core_type = #tpu.core_type<tc>, window_params = [{transform_indices = @transform_0, window_bounds = array<i64: 32, 128>}, {pipeline_mode = #tpu.pipeline_mode<synchronous>, transform_indices = @transform_1, window_bounds = array<i64: 128, 128>}, {pipeline_mode = #tpu.pipeline_mode<synchronous>, transform_indices = @transform_2, window_bounds = array<i64: 1, 128>}, {pipeline_mode = #tpu.pipeline_mode<synchronous>, transform_indices = @transform_3, window_bounds = array<i64: 128, 128>}, {pipeline_mode = #tpu.pipeline_mode<synchronous>, transform_indices = @transform_4, window_bounds = array<i64: 1, 128>}, {pipeline_mode = #tpu.pipeline_mode<synchronous>, transform_indices = @transform_5, window_bounds = array<i64: 128, 128>}, {pipeline_mode = #tpu.pipeline_mode<synchronous>, transform_indices = @transform_6, window_bounds = array<i64: 1, 128>}, {transform_indices = @transform_7, window_bounds = array<i64: 32, 128>}, {transform_indices = @transform_8, window_bounds = array<i64: 32, 128>}]} {
    %c0 = arith.constant 0 : index
    %c0_0 = arith.constant 0 : index
    %0 = vector.load %arg1[%c0, %c0_0] : memref<32x128xbf16, #tpu.memory_space<vmem>>, vector<32x128xbf16>
    %c0_1 = arith.constant 0 : index
    %c0_2 = arith.constant 0 : index
    %1 = vector.load %arg2[%c0_1, %c0_2] : memref<128x128xbf16, #tpu.memory_space<vmem>>, vector<128x128xbf16>
    %cst = arith.constant dense<0.000000e+00> : vector<32x128xf32>
    %2 = tpu.matmul %0, %1, %cst {dimension_numbers = #tpu.dot_dimension_numbers<[1], [0], [0], [1], [0, 0, 1, 1], [], []>} : vector<32x128xbf16>, vector<128x128xbf16>, vector<32x128xf32> -> vector<32x128xf32>
    %c0_3 = arith.constant 0 : index
    %c0_4 = arith.constant 0 : index
    %3 = vector.load %arg3[%c0_3, %c0_4] : memref<1x128xf32, #tpu.memory_space<vmem>>, vector<1x128xf32>
    %4 = vector.broadcast %3 : vector<1x128xf32> to vector<32x128xf32>
    %5 = arith.addf %2, %4 : vector<32x128xf32>
    %cst_5 = arith.constant 0.000000e+00 : f32
    %6 = vector.broadcast %cst_5 : f32 to vector<32x128xf32>
    %7 = arith.maximumf %5, %6 : vector<32x128xf32>
    %c0_6 = arith.constant 0 : index
    %c0_7 = arith.constant 0 : index
    %8 = vector.load %arg8[%c0_6, %c0_7] : memref<32x128xf32, #tpu.memory_space<vmem>>, vector<32x128xf32>
    tpu.vector_store %arg8[%c0_6, %c0_7], %7 {strides = array<i32>} : memref<32x128xf32, #tpu.memory_space<vmem>>, vector<32x128xf32>,
    %9 = arith.truncf %7 : vector<32x128xf32> to vector<32x128xbf16>
    %c0_8 = arith.constant 0 : index
    %c0_9 = arith.constant 0 : index
    %10 = vector.load %arg4[%c0_8, %c0_9] : memref<128x128xbf16, #tpu.memory_space<vmem>>, vector<128x128xbf16>
    %cst_10 = arith.constant dense<0.000000e+00> : vector<32x128xf32>
    %11 = tpu.matmul %9, %10, %cst_10 {dimension_numbers = #tpu.dot_dimension_numbers<[1], [0], [0], [1], [0, 0, 1, 1], [], []>} : vector<32x128xbf16>, vector<128x128xbf16>, vector<32x128xf32> -> vector<32x128xf32>
    %c0_11 = arith.constant 0 : index
    %c0_12 = arith.constant 0 : index
    %12 = vector.load %arg5[%c0_11, %c0_12] : memref<1x128xf32, #tpu.memory_space<vmem>>, vector<1x128xf32>
    %13 = vector.broadcast %12 : vector<1x128xf32> to vector<32x128xf32>
    %14 = arith.addf %11, %13 : vector<32x128xf32>
    %cst_13 = arith.constant 0.000000e+00 : f32
    %15 = vector.broadcast %cst_13 : f32 to vector<32x128xf32>
    %16 = arith.maximumf %14, %15 : vector<32x128xf32>
    %17 = arith.truncf %16 : vector<32x128xf32> to vector<32x128xbf16>
    %c0_14 = arith.constant 0 : index
    %c0_15 = arith.constant 0 : index
    %18 = vector.load %arg6[%c0_14, %c0_15] : memref<128x128xbf16, #tpu.memory_space<vmem>>, vector<128x128xbf16>
    %cst_16 = arith.constant dense<0.000000e+00> : vector<32x128xf32>
    %19 = tpu.matmul %17, %18, %cst_16 {dimension_numbers = #tpu.dot_dimension_numbers<[1], [0], [0], [1], [0, 0, 1, 1], [], []>} : vector<32x128xbf16>, vector<128x128xbf16>, vector<32x128xf32> -> vector<32x128xf32>
    %c0_17 = arith.constant 0 : index
    %c0_18 = arith.constant 0 : index
    %20 = vector.load %arg7[%c0_17, %c0_18] : memref<1x128xf32, #tpu.memory_space<vmem>>, vector<1x128xf32>
    %21 = vector.broadcast %20 : vector<1x128xf32> to vector<32x128xf32>
    %22 = arith.addf %19, %21 : vector<32x128xf32>
    %c0_19 = arith.constant 0 : index
    %c0_20 = arith.constant 0 : index
    %23 = vector.load %arg9[%c0_19, %c0_20] : memref<32x128xf32, #tpu.memory_space<vmem>>, vector<32x128xf32>
    tpu.vector_store %arg9[%c0_19, %c0_20], %22 {strides = array<i32>} : memref<32x128xf32, #tpu.memory_space<vmem>>, vector<32x128xf32>,
    return
  }
  func.func @transform_0(%arg0: i32) -> (i32, i32) {
    %c0_i32 = arith.constant 0 : i32
    %c0_i32_0 = arith.constant 0 : i32
    return %arg0, %c0_i32 : i32, i32
  }
  func.func @transform_1(%arg0: i32) -> (i32, i32) {
    %c0_i32 = arith.constant 0 : i32
    %c0_i32_0 = arith.constant 0 : i32
    %c0_i32_1 = arith.constant 0 : i32
    return %c0_i32, %c0_i32_0 : i32, i32
  }
  func.func @transform_2(%arg0: i32) -> (i32, i32) {
    %c0_i32 = arith.constant 0 : i32
    %c0_i32_0 = arith.constant 0 : i32
    %c0_i32_1 = arith.constant 0 : i32
    return %c0_i32, %c0_i32_0 : i32, i32
  }
  func.func @transform_3(%arg0: i32) -> (i32, i32) {
    %c0_i32 = arith.constant 0 : i32
    %c0_i32_0 = arith.constant 0 : i32
    %c0_i32_1 = arith.constant 0 : i32
    return %c0_i32, %c0_i32_0 : i32, i32
  }
  func.func @transform_4(%arg0: i32) -> (i32, i32) {
    %c0_i32 = arith.constant 0 : i32
    %c0_i32_0 = arith.constant 0 : i32
    %c0_i32_1 = arith.constant 0 : i32
    return %c0_i32, %c0_i32_0 : i32, i32
  }
  func.func @transform_5(%arg0: i32) -> (i32, i32) {
    %c0_i32 = arith.constant 0 : i32
    %c0_i32_0 = arith.constant 0 : i32
    %c0_i32_1 = arith.constant 0 : i32
    return %c0_i32, %c0_i32_0 : i32, i32
  }
  func.func @transform_6(%arg0: i32) -> (i32, i32) {
    %c0_i32 = arith.constant 0 : i32
    %c0_i32_0 = arith.constant 0 : i32
    %c0_i32_1 = arith.constant 0 : i32
    return %c0_i32, %c0_i32_0 : i32, i32
  }
  func.func @transform_7(%arg0: i32) -> (i32, i32) {
    %c0_i32 = arith.constant 0 : i32
    %c0_i32_0 = arith.constant 0 : i32
    return %arg0, %c0_i32 : i32, i32
  }
  func.func @transform_8(%arg0: i32) -> (i32, i32) {
    %c0_i32 = arith.constant 0 : i32
    %c0_i32_0 = arith.constant 0 : i32
    return %arg0, %c0_i32 : i32, i32
  }
}

</mosaic_0001>

<bundles_post_ra>
// kernel: actor_policy_forward.1
= control target key start
LH: loop header
LB: loop body
LE: loop exit
PB: predicated region body
PF: predicated region fallthrough
CT: control target
= control target key end

     0   :  { %14 = vsyncpa [#allocation3], 0  ;;  %s1434_s0 = inlined_call_operand.vmem [shape: bf16[64,128], index: 0, kind: input, shape index: {}]   ;;  %s1435_s1 = inlined_call_operand.vmem [shape: bf16[128,128], index: 1, kind: input, shape index: {}]   ;;  %s1436_s2 = inlined_call_operand.vmem [shape: f32[1,128], index: 2, kind: input, shape index: {}]   ;;  %s1437_s3 = inlined_call_operand.vmem [shape: bf16[128,128], index: 3, kind: input, shape index: {}]   ;;  %s1438_s4 = inlined_call_operand.vmem [shape: f32[1,128], index: 4, kind: input, shape index: {}]   ;;  %s1439_s5 = inlined_call_operand.hbm [shape: bf16[128,128], index: 5, kind: input, shape index: {}]   ;;  %s1440_s6 = inlined_call_operand.vmem [shape: f32[1,128], index: 6, kind: input, shape index: {}]   ;;  %s1441_s7 = inlined_call_operand.hbm [shape: f32[64,128], index: 7, kind: output, shape index: {0}]   ;;  %s1442_s8 = inlined_call_operand.vmem [shape: f32[64,128], index: 8, kind: output, shape index: {1}]  }
   0x1   :  { %15 = vsyncpa [#allocation4], 0 }
   0x2   :  { %17 = vsyncpa [#allocation4 + $0x1], 0  ;;  %s1218_s27 = smov 0   ;;  %s1220_s28 = smov 0  }
   0x3   :  { %s1222_s29 = smov 0   ;;  %s1224_s30 = smov 0  }
   0x4 LB: > { %s1239_s9 = sadd.s32 4294967295, %s1165_s30   ;;  %s855_s10 = sadd.s32 4294967294, %s1165_s30   ;;  %s1165_s30 = sphi %s1224_s30, %s1458_s30   ;;  %s1161_s29 = sphi %s1222_s29, %s1457_s29   ;;  %s1157_s28 = sphi %s1220_s28, %s1456_s28   ;;  %s1153_s27 = sphi %s1218_s27, %s1455_s27  }
   0x5   : > { %s1243_s11 = sadd.s32 1, %s1165_s30   ;;  %s182_s12 = sadd.s32 1, %s1161_s29 }
   0x6   : > { %s179_s13 = ssub.s32 %s1165_s30, %s1243_s11  ;;  %p192_p0 = scmp.ne.s32.totalorder %s1161_s29, %s1157_s28 }
   0x7   : > { %p180_p1 = scmp.eq.s32.totalorder %s179_s13, 0  ;;  %p193_p2 = scmp.eq.s32.totalorder %s1239_s9, 1 }
   0x8   : > { %p198_p3 = scmp.ne.s32.totalorder %s1157_s28, %s1153_s27  ;;  %p199_p4 = scmp.eq.s32.totalorder %s855_s10, 1 }
   0x9   : > { %s1254_s14 = scalar_select %p180_p1, %s1161_s29, %s182_s12  }
   0xa   : > { %p1256_p5 = por %p193_p2, %p192_p0  ;;  %p1260_p6 = por %p199_p4, %p198_p3 }
   0xb   : > { %p856_p7 = scmp.ge.s32.totalorder %s1165_s30, 1  ;;  %p232_p8 = scmp.lt.s32.totalorder %s1165_s30, 3 }
   0xc   : > { %s1446_s15 = scalar_select %p1256_p5, 1, 0 }
   0xd   : > { %s1447_s16 = scalar_select %p1260_p6, 1, 0 }
   0xe   : > { %p1443_p9 = scmp.eq.s32.totalorder %s1239_s9, 0  ;;  %p1267_p10 = pnand %p856_p7, %p232_p8 }
   0xf   : > { %s1167_s18 = smov [#allocation2]   ;;  %s1071_s23 = scalar_lea.hbm %s1439_s5, 1024 }
  0x10   : > { %s1448_s17 = scalar_select %p1267_p10, 1, 0 }
  0x11   : > { %s256_s19 = sshll.u32 %s1167_s18, 4  ;;  %p997_p11 = pneg %p1267_p10  ;;  %s257_s19 = int_to_ptr.vmem [resolvable:$true] %s256_s19 }
  0x12   : > { %p1072_p13 = scmp.ne.s32.totalorder %s1439_s5, %s1071_s23  ;;  %p1078_p3 = scmp.lt.u32.totalorder %s1071_s23, %s1439_s5 }
  0x13   : > { %p1275_p12 = pnand %p1443_p9, %p997_p11 }
  0x15   : > { %p1073_p0 = pneg %p1275_p12 }
  0x17   : > { %p1074_p1 = pnand %p1073_p0, %p1072_p13 }
  0x19   : > { %p1075_p2 = pneg %p1074_p1 }
  0x1b   : > { %p1080_p4 = pnand %p1078_p3, %p1075_p2 }
  0x1d   : > { %1083 = shalt.err (!%p1080_p4)
}
  0x1e   : > { %s1084_s12 = scalar_lea.vmem %s257_s19, 1024  ;;  %p1092_p9 = scmp.lt.s32.totalorder %s257_s19, %s257_s19 }
  0x1f   : > { %p1085_p7 = scmp.ne.s32.totalorder %s257_s19, %s1084_s12  ;;  %p1093_p6 = scmp.lt.s32.totalorder %s1084_s12, %s1084_s12 }
  0x21   : > { %p1087_p8 = pnand %p1085_p7, %p1073_p0  ;;  %p1094_p5 = por %p1093_p6, %p1092_p9 }
  0x23   : > { %p1088_p11 = pneg %p1087_p8 }
  0x25   : > { %p1095_p10 = pnand %p1094_p5, %p1088_p11 }
  0x27   : > { %1098 = shalt.err (!%p1095_p10)
}
  0x28   : > { %s1168_s13 = smov 64   ;;  %s1169_s18 = smov 4  }
  0x29   : > { %1000 = dma.hbm_to_vmem [thread:$0]  (!%p1275_p12), %s1439_s5, 1024, %s257_s19, [#allocation3], %s1168_s13, %s1168_s13, %s1169_s18  }
  0x2a   : > { %p1450_p13 = scmp.ne.s32.totalorder %s1448_s17, 0 }
  0x2b   : > { %p1451_p1 = scmp.eq.s32.totalorder (!%p1450_p13), %s1239_s9, 0 }
  0x2c   : > { %284 = sbr.rel (%p1450_p13) target bundleno = 747 (0x2eb), region = 48 }
  0x33   : > { %1144 = dma.done.wait (%p1451_p1), [#allocation3], 1024   ;;  %p1452_p0 = pmov %p1451_p1 }
  0x34   : > { %s862_s23 = sshll.u32 %s1239_s9, 2  ;;  %v1045_v0 = vld [vmem:[%s1435_s1] sm:$0xff]   ;;  %v1046_v1 = vld [vmem:[%s1435_s1 + $0x8] sm:$0xff]   ;;  %v1047_v2 = vld [vmem:[%s1435_s1 + $0x10] sm:$0xff]   ;;  %s900_s21 = sshll.u32 %s1239_s9, 9 }
  0x35   : > { %1146 = vsyncadd (%p1452_p0), [#allocation3], 4294966272  ;;  %p324_p5 = scmp.lt.s32.totalorder %s862_s23, 7  ;;  %931 = vmatprep.subr.bf16.mxu0 %v1045_v0  ;;  %v1048_v3 = vld [vmem:[%s1435_s1 + $0x18] sm:$0xff]   ;;  %v1055_v5 = vld [vmem:[%s1437_s3] sm:$0xff]   ;;  %s1382_s20 = scalar_lea.hbm %s1441_s7, %s900_s21 }
  0x36   : > { %932 = vmatpush3.bf16.msra.mxu0 %v1045_v0  ;;  %v1056_v6 = vld [vmem:[%s1437_s3 + $0x8] sm:$0xff]   ;;  %v1049_v7 = vld [vmem:[%s1435_s1 + $0x20] sm:$0xff]   ;;  %951 = vmatprep.subr.bf16.mxu1 %v1055_v5  ;;  %v1057_v8 = vld [vmem:[%s1437_s3 + $0x10] sm:$0xff]   ;;  %p1453_p9 = scmp.ne.s32.totalorder %s1446_s15, 0 }
  0x37   : > { %s1460_s23 = smov (!%p324_p5, %s862_s23), 7  ;;  %933 = vmatprep.subr.bf16.mxu0 %v1046_v1  ;;  %952 = vmatpush3.bf16.msra.mxu1 %v1055_v5  ;;  %v1050_v9 = vld [vmem:[%s1435_s1 + $0x28] sm:$0xff]   ;;  %v1058_v10 = vld [vmem:[%s1437_s3 + $0x18] sm:$0xff]   ;;  %v1051_v11 = vld [vmem:[%s1435_s1 + $0x30] sm:$0xff]  }
  0x38   : > { %s863_s17 = sshll.u32 %s1460_s23, 2  ;;  %953 = vmatprep.subr.bf16.mxu1 %v1056_v6  ;;  %v1059_v12 = vld [vmem:[%s1437_s3 + $0x20] sm:$0xff]   ;;  %v1052_v13 = vld [vmem:[%s1435_s1 + $0x38] sm:$0xff]   ;;  %v1060_v14 = vld [vmem:[%s1437_s3 + $0x28] sm:$0xff]  }
  0x39   : > { %s1317_s18 = scalar_lea.vmem %s1434_s0, %s863_s17  ;;  %v1061_v16 = vld [vmem:[%s1437_s3 + $0x30] sm:$0xff]   ;;  %v1062_v17 = vld [vmem:[%s1437_s3 + $0x38] sm:$0xff]   ;;  %v1063_v18 = vld [vmem:[#allocation2] sm:$0xff]  }
  0x3a   : > { %934 = vmatpush3.bf16.msra.mxu0 %v1046_v1  ;;  %v1053_v4 = vld [vmem:[%s1317_s18] sm:$0xff]   ;;  %v1054_v15 = vld [vmem:[%s1317_s18 + $0x8] sm:$0xff]   ;;  %v1065_v20 = vld [vmem:[#allocation2 + $0x10] sm:$0xff]   ;;  %s313_s18 = sand.u32 1, %s1157_s28  }
  0x3b   : > { %935 = vmatprep.subr.bf16.mxu0 %v1047_v2  ;;  %947 = vmatprep.mubr.bf16.mxu0 %v1053_v4  ;;  %v1064_v19 = vld [vmem:[#allocation2 + $0x8] sm:$0xff]   ;;  %v1066_v21 = vld [vmem:[#allocation2 + $0x18] sm:$0xff]   ;;  %v1067_v22 = vld [vmem:[#allocation2 + $0x20] sm:$0xff]   ;;  %s861_s17 = sshll.u32 %s313_s18, 5  ;;  %s1386_s19 = scalar_lea.sflag [#allocation4], %s313_s18 }
  0x3c   : > { %954 = vmatpush3.bf16.msra.mxu1 %v1056_v6  ;;  %v1068_v23 = vld [vmem:[#allocation2 + $0x28] sm:$0xff]   ;;  %v866_v24 = vld [vmem:[%s1436_s2] ss:$0 sm:$0xff]  ;;  %s1366_s26 = scalar_lea.vmem [#allocation5], %s861_s17  ;;  %v1069_v39 = vld [vmem:[#allocation2 + $0x30] sm:$0xff]   ;;  %s1170_s17 = smov [#allocation5]  }
  0x3d   : > { %955 = vmatprep.subr.bf16.mxu1 %v1057_v8  ;;  %v1070_v40 = vld [vmem:[#allocation2 + $0x38] sm:$0xff]   ;;  %v877_v41 = vld [vmem:[%s1438_s4] ss:$0 sm:$0xff]  ;;  %s752_s13 = sshll.u32 %s1366_s26, 4  ;;  %s1376_s13 = int_to_ptr.vmem [resolvable:$true] %s752_s13 }
  0x3e   : > { %936 = vmatpush3.bf16.msra.mxu0 %v1047_v2  ;;  %s1099_s25 = scalar_lea.vmem %s1376_s13, 512 }
  0x3f   : > { %937 = vmatprep.subr.bf16.mxu0 %v1048_v3  ;;  %p1100_p6 = scmp.ne.s32.totalorder %s1376_s13, %s1099_s25 }
  0x40   : > { %956 = vmatpush3.bf16.msra.mxu1 %v1057_v8 }
  0x41   : > { %957 = vmatprep.subr.bf16.mxu1 %v1058_v10  ;;  %p1101_p10 = pnand %p1100_p6, %p1453_p9 }
  0x42   : > { %938 = vmatpush3.bf16.msra.mxu0 %v1048_v3 }
  0x43   : > { %939 = vmatprep.subr.bf16.mxu0 %v1049_v7  ;;  %p1102_p12 = pneg %p1101_p10 }
  0x44   : > { %958 = vmatpush3.bf16.msra.mxu1 %v1058_v10 }
  0x45   : > { %959 = vmatprep.subr.bf16.mxu1 %v1059_v12 }
  0x46   : > { %940 = vmatpush3.bf16.msra.mxu0 %v1049_v7 }
  0x47   : > { %941 = vmatprep.subr.bf16.mxu0 %v1050_v9 }
  0x48   : > { %960 = vmatpush3.bf16.msra.mxu1 %v1059_v12 }
  0x49   : > { %961 = vmatprep.subr.bf16.mxu1 %v1060_v14 }
  0x4a   : > { %942 = vmatpush3.bf16.msra.mxu0 %v1050_v9 }
  0x4b   : > { %943 = vmatprep.subr.bf16.mxu0 %v1051_v11 }
  0x4c   : > { %962 = vmatpush3.bf16.msra.mxu1 %v1060_v14 }
  0x4d   : > { %963 = vmatprep.subr.bf16.mxu1 %v1061_v16 }
  0x4e   : > { %944 = vmatpush3.bf16.msra.mxu0 %v1051_v11 }
  0x4f   : > { %945 = vmatprep.subr.bf16.mxu0 %v1052_v13 }
  0x50   : > { %964 = vmatpush3.bf16.msra.mxu1 %v1061_v16 }
  0x51   : > { %965 = vmatprep.subr.bf16.mxu1 %v1062_v17 }
  0x52   : > { %946 = vmatpush3.bf16.msra.mxu0 %v1052_v13 }
  0x53   : > { %971 = vmatprep.subr.bf16.mxu0 %v1063_v18 }
  0x54   : > { %966 = vmatpush3.bf16.msra.mxu1 %v1062_v17 }
  0x55   : > { %948 = vmatmul.mubr.bf16.vlgmr.msra.gmra.mrb[0].mxu0 %v1054_v15 }
  0x56   : > { %972 = vmatpush3.bf16.msra.mxu0 %v1063_v18 }
  0x57   : > { %973 = vmatprep.subr.bf16.mxu0 %v1064_v19 }
  0x5a   : > { %974 = vmatpush3.bf16.msra.mxu0 %v1064_v19 }
  0x5b   : > { %975 = vmatprep.subr.bf16.mxu0 %v1065_v20 }
  0x5e   : > { %976 = vmatpush3.bf16.msra.mxu0 %v1065_v20 }
  0x5f   : > { %977 = vmatprep.subr.bf16.mxu0 %v1066_v21 }
  0x62   : > { %978 = vmatpush3.bf16.msra.mxu0 %v1066_v21 }
  0x63   : > { %979 = vmatprep.subr.bf16.mxu0 %v1067_v22 }
  0x66   : > { %980 = vmatpush3.bf16.msra.mxu0 %v1067_v22 }
  0x67   : > { %981 = vmatprep.subr.bf16.mxu0 %v1068_v23 }
  0x6a   : > { %982 = vmatpush3.bf16.msra.mxu0 %v1068_v23 }
  0x6b   : > { %983 = vmatprep.subr.bf16.mxu0 %v1069_v39 }
  0x6e   : > { %984 = vmatpush3.bf16.msra.mxu0 %v1069_v39 }
  0x6f   : > { %985 = vmatprep.subr.bf16.mxu0 %v1070_v40 }
  0x72   : > { %986 = vmatpush3.bf16.msra.mxu0 %v1070_v40 }
 0x128   : > { %v949_v25 = vpop.f32.mrb[0].mxu0 }
 0x129   : > { %v467_v26 = vadd.f32 %v949_v25, %v866_v24  ;;  %v458_v27 = vpop.f32.mrb[1].mxu0 }
 0x12a   : > { %v459_v28 = vadd.f32 %v866_v24, %v458_v27  ;;  %v950_v29 = vpop.f32.mrb[2].mxu0 }
 0x12b   : > { %v475_v30 = vmax.f32 %v467_v26, 0.0  ;;  %v470_v31 = vadd.f32 %v950_v29, %v866_v24  ;;  %v461_v32 = vpop.f32.mrb[3].mxu0 }
 0x12c   : > { %v473_v33 = vmax.f32 %v459_v28, 0.0  ;;  %v462_v34 = vadd.f32 %v866_v24, %v461_v32 }
 0x12d   : > { %479 = vst [vmem:[%s1366_s26 + $0x10] sm:$0xff] %v475_v30  ;;  %v476_v35 = vmax.f32 %v470_v31, 0.0 }
 0x12e   : > { %477 = vst [vmem:[%s1366_s26] sm:$0xff] %v473_v33  ;;  %v474_v36 = vmax.f32 %v462_v34, 0.0 }
 0x12f   : > { %480 = vst [vmem:[%s1366_s26 + $0x18] sm:$0xff] %v476_v35  ;;  %v482_v37 = vpack.c.bf16 %v476_v35, %v475_v30 }
 0x130   : > { %478 = vst [vmem:[%s1366_s26 + $0x8] sm:$0xff] %v474_v36  ;;  %v481_v38 = vpack.c.bf16 %v474_v36, %v473_v33  ;;  %s1103_s26 = sshll.u32 %s1170_s17, 4  ;;  %s1104_s26 = int_to_ptr.vmem [resolvable:$false] %s1103_s26 }
 0x131   : > { %s1105_s10 = scalar_lea.vmem %s1104_s26, 1024  ;;  %p1106_p2 = scmp.lt.s32.totalorder %s1376_s13, %s1104_s26 }
 0x132   : > { %967 = vmatprep.mubr.bf16.mxu1 %v481_v38  ;;  %p1107_p3 = scmp.lt.s32.totalorder %s1105_s10, %s1099_s25 }
 0x133   : > { %968 = vmatmul.mubr.bf16.vlgmr.msra.gmra.mrb[0].mxu1 %v482_v37 }
 0x134   : > { %p1108_p4 = por %p1107_p3, %p1106_p2 }
 0x136   : > { %p1109_p7 = pnand %p1108_p4, %p1102_p12 }
 0x206   : > { %v969_v42 = vpop.f32.mrb[0].mxu1 }
 0x207   : > { %v597_v43 = vadd.f32 %v969_v42, %v877_v41  ;;  %v588_v44 = vpop.f32.mrb[1].mxu1 }
 0x208   : > { %v589_v45 = vadd.f32 %v877_v41, %v588_v44  ;;  %v970_v46 = vpop.f32.mrb[2].mxu1 }
 0x209   : > { %v600_v47 = vadd.f32 %v970_v46, %v877_v41  ;;  %v591_v48 = vpop.f32.mrb[3].mxu1  ;;  %v605_v50 = vmax.f32 %v597_v43, 0.0 }
 0x20a   : > { %v592_v49 = vadd.f32 %v877_v41, %v591_v48  ;;  %v603_v52 = vmax.f32 %v589_v45, 0.0 }
 0x20b   : > { %v606_v51 = vmax.f32 %v600_v47, 0.0 }
 0x20c   : > { %v604_v53 = vmax.f32 %v592_v49, 0.0 }
 0x20d   : > { %v608_v54 = vpack.c.bf16 %v606_v51, %v605_v50 }
 0x20e   : > { %v607_v55 = vpack.c.bf16 %v604_v53, %v603_v52 }
 0x210   : > { %987 = vmatprep.mubr.bf16.mxu0 %v607_v55 }
 0x211   : > { %988 = vmatmul.mubr.bf16.vlgmr.msra.gmra.mrb[4].mxu0 %v608_v54 }
 0x212   : > { %1112 = shalt.err (!%p1109_p7)
}
 0x213   : > { %s1113_s9 = scalar_lea.hbm %s1382_s20, 512  ;;  %s1117_s21 = scalar_lea.hbm %s1441_s7, 1024 }
 0x214   : > { %p1114_p8 = scmp.ne.s32.totalorder %s1382_s20, %s1113_s9  ;;  %p1118_p1 = scmp.lt.u32.totalorder %s1382_s20, %s1441_s7 }
 0x215   : > { %p1119_p0 = scmp.lt.u32.totalorder %s1117_s21, %s1113_s9  ;;  %p1121_p6 = scmp.lt.u32.totalorder %s1113_s9, %s1382_s20 }
 0x216   : > { %p1115_p11 = pnand %p1114_p8, %p1453_p9 }
 0x217   : > { %p1120_p5 = por %p1119_p0, %p1118_p1 }
 0x218   : > { %p1116_p13 = pneg %p1115_p11 }
 0x219   : > { %p1122_p10 = por %p1121_p6, %p1120_p5 }
 0x21b   : > { %p1123_p12 = pnand %p1122_p10, %p1116_p13 }
 0x21d   : > { %1126 = shalt.err (!%p1123_p12)
}
 0x21e   : > { %s1171_s25 = smov 128   ;;  %s1172_s17 = smov 8   ;;  %v886_v56 = vld [vmem:[%s1440_s6] ss:$0 sm:$0xff] }
 0x21f   : > { %995 = dma.vmem_to_hbm [thread:$0]  (%p1453_p9), %s1376_s13, 512, %s1382_s20, %s1386_s19, %s1171_s25, %s1171_s25, %s1172_s17  }
 0x220   : > { %s865_s26 = sshll.u32 %s1460_s23, 3 }
 0x221   : > { %s334_s21 = scalar_lea.vmem %s1442_s8, %s865_s26 }
 0x2e4   : > { %v989_v57 = vpop.f32.mrb[4].mxu0 }
 0x2e5   : > { %v714_v58 = vpop.f32.mrb[5].mxu0  ;;  %v723_v63 = vadd.f32 %v989_v57, %v886_v56 }
 0x2e6   : > { %v715_v59 = vadd.f32 %v886_v56, %v714_v58  ;;  %v990_v60 = vpop.f32.mrb[6].mxu0 }
 0x2e7   : > { %v717_v61 = vpop.f32.mrb[7].mxu0  ;;  %v726_v0 = vadd.f32 %v990_v60, %v886_v56  ;;  %731 = vst [vmem:[%s334_s21 + $0x10] sm:$0xff] %v723_v63 }
 0x2e8   : > { %729 = vst [vmem:[%s334_s21] sm:$0xff] %v715_v59  ;;  %v718_v62 = vadd.f32 %v886_v56, %v717_v61 }
 0x2e9   : > { %732 = vst [vmem:[%s334_s21 + $0x18] sm:$0xff] %v726_v0 }
 0x2ea   : > { %730 = vst [vmem:[%s334_s21 + $0x8] sm:$0xff] %v718_v62 }
 0x2eb PF: > { %p1007_p9 = scmp.ge.s32.totalorder %s1165_s30, 2  ;;  %s771_s15 = sand.u32 1, %s1153_s27  }
 0x2ec   : > { %p1454_p2 = scmp.ne.s32.totalorder %s1447_s16, 0  ;;  %s772_s23 = scalar_lea.sflag [#allocation4], %s771_s15 }
 0x2ee   : > { %p1002_p3 = pnand %p1007_p9, %p1454_p2 }
 0x2f0   : > { %1148 = dma.done.wait (!%p1002_p3), %s772_s23, 512  }
 0x2f1   : > { %1150 = vsyncadd (!%p1002_p3), %s772_s23, 4294966784  ;;  %p20_p4 = scmp.ge.s32.totalorder %s1243_s11, 4   ;;  %s1455_s27 = smov %s1157_s28 }
 0x2f2   : > { %s1456_s28 = smov %s1161_s29  ;;  %s1457_s29 = smov %s1254_s14 }
 0x2f3   : > { %s1458_s30 = smov %s1243_s11  ;;  %22 = sbr.rel (!%p20_p4) target bundleno = 4 (0x4), region = 100 }
 0x2fa   :  { %785 = vsyncpa [#allocation3], 1 }
 0x2fb   :  { %787 = vsyncpa [#allocation3 + $0x1], 1 }
 0x2fc   :  { %788 = vsyncpa [#allocation4], 1 }
 0x2fd   :  { %790 = vsyncpa [#allocation4 + $0x1], 1 }

</bundles_post_ra>
